<compile_context>
chip_gen: v6e
topology: v6e:2x2x1
jax: 0.10.0
libtpu: 0.0.40
codegen_flags: <defaults>
</compile_context>

<pallas_src>
import functools

import jax
import jax.numpy as jnp
from jax.experimental import pallas as pl
from jax.experimental.pallas import tpu as pltpu


def _round_up(v: int, m: int) -> int:
    return ((v + m - 1) // m) * m


def _choose_tile_b(batch: int, max_tile: int = 256, sublane: int = 32) -> int:
    """Balanced batch tile: minimize last-tile padding, >=2 steps if possible."""
    num_tiles = pl.cdiv(batch, max_tile)
    if num_tiles == 1 and batch > sublane:
        num_tiles = 2          # let v7x's two TensorCores both get work
    return _round_up(pl.cdiv(batch, num_tiles), sublane)


def _decoder_kernel(training: bool, scale: float, *refs):
    """Fused: dropout(x) -> x@W1+b1 -> relu -> @W2+b2 for one batch tile."""
    if training:
        x_ref, mask_ref, w1_ref, b1_ref, w2_ref, b2_ref, o_ref = refs
        # Inverted dropout: int8 keep-mask * compile-time 1/(1-p) scale (VPU).
        xf = x_ref[...].astype(jnp.float32) * (
            mask_ref[...].astype(jnp.float32) * scale)
        x = xf.astype(jnp.bfloat16)
    else:
        x_ref, w1_ref, b1_ref, w2_ref, b2_ref, o_ref = refs
        x = x_ref[...]                                   # already bf16

    # bf16 operands, f32 accumulation on the MXU.
    h = jnp.dot(x, w1_ref[...], preferred_element_type=jnp.float32) + b1_ref[...]
    h = jnp.maximum(h, 0.0)                              # ReLU on the VPU (f32)
    out = jnp.dot(h.astype(jnp.bfloat16), w2_ref[...],
                  preferred_element_type=jnp.float32) + b2_ref[...]
    o_ref[...] = out.astype(o_ref.dtype)


def prepare_decoder_params(w1, b1, w2, b2):
    """Pad/cast parameters once (hoisted out of the per-call path).

    w1: [n_bottleneck, n_hidden], b1: [n_hidden],
    w2: [n_hidden, n_output],     b2: [n_output].
    Weights -> bf16 padded to 128 multiples; biases -> f32 padded, shape [1, F].
    """
    n_in, n_hidden = w1.shape
    n_out = w2.shape[1]
    n_in_p = _round_up(n_in, 128)
    n_hid_p = _round_up(n_hidden, 128)
    n_out_p = _round_up(n_out, 128)

    w1_p = jnp.pad(w1.astype(jnp.bfloat16),
                   ((0, n_in_p - n_in), (0, n_hid_p - n_hidden)))
    b1_p = jnp.pad(b1.astype(jnp.float32).reshape(1, n_hidden),
                   ((0, 0), (0, n_hid_p - n_hidden)))
    w2_p = jnp.pad(w2.astype(jnp.bfloat16),
                   ((0, n_hid_p - n_hidden), (0, n_out_p - n_out)))
    b2_p = jnp.pad(b2.astype(jnp.float32).reshape(1, n_out),
                   ((0, 0), (0, n_out_p - n_out)))
    return dict(w1=w1_p, b1=b1_p, w2=w2_p, b2=b2_p,
                n_in=n_in, n_hidden=n_hidden, n_out=n_out)


def decoder_forward(x, params, *, training=False, p_drop=0.2, key=None,
                    max_tile_b=256, single_buffer_weights=True):
    """x: [B, n_bottleneck] f32. Returns [B, n_output] f32."""
    assert 0.0 <= p_drop < 1.0, "p_drop must be in [0, 1)"
    w1_p, b1_p, w2_p, b2_p = params["w1"], params["b1"], params["w2"], params["b2"]
    n_in, n_out = params["n_in"], params["n_out"]
    n_in_p, n_hid_p = w1_p.shape
    n_out_p = w2_p.shape[1]

    B = x.shape[0]
    assert x.shape[1] == n_in

    tile_b = _choose_tile_b(B, max_tile_b)
    b_pad = _round_up(B, tile_b)
    grid = (b_pad // tile_b,)

    # Per-call activation prep (padding keeps every tile lane/sublane aligned;
    # padded rows/cols are zero and are sliced off / absorbed by zero weights).
    x_p = jnp.pad(x.astype(jnp.bfloat16),
                  ((0, b_pad - B), (0, n_in_p - n_in)))

    inputs = [x_p]
    in_specs = [pl.BlockSpec((tile_b, n_in_p), lambda i: (i, 0))]

    if training:
        if key is None:
            key = jax.random.PRNGKey(0)
        keep = jax.random.bernoulli(key, 1.0 - p_drop, (B, n_in)).astype(jnp.int8)
        mask_p = jnp.pad(keep, ((0, b_pad - B), (0, n_in_p - n_in)))
        inputs.append(mask_p)
        in_specs.append(pl.BlockSpec((tile_b, n_in_p), lambda i: (i, 0)))

    # Weights/biases are grid-invariant -> single-buffer them if supported.
    weight_kwargs = {}
    if single_buffer_weights and hasattr(pl, "Buffered"):
        weight_kwargs = dict(pipeline_mode=pl.Buffered(1))

    inputs += [w1_p, b1_p, w2_p, b2_p]
    in_specs += [
        pl.BlockSpec((n_in_p, n_hid_p), lambda i: (0, 0), **weight_kwargs),
        pl.BlockSpec((1, n_hid_p), lambda i: (0, 0), **weight_kwargs),
        pl.BlockSpec((n_hid_p, n_out_p), lambda i: (0, 0), **weight_kwargs),
        pl.BlockSpec((1, n_out_p), lambda i: (0, 0), **weight_kwargs),
    ]

    # Advisory cost estimate so XLA can overlap surrounding pad/mask ops.
    flops = 2 * b_pad * (n_in_p * n_hid_p + n_hid_p * n_out_p)
    bytes_accessed = (
        b_pad * n_in_p * 2
        + (b_pad * n_in_p if training else 0)
        + (n_in_p * n_hid_p + n_hid_p * n_out_p) * 2
        + (n_hid_p + n_out_p) * 4
        + b_pad * n_out_p * 4
    )
    cost = pl.CostEstimate(flops=flops, transcendentals=0,
                           bytes_accessed=bytes_accessed)

    # VMEM budget from actual buffer sizes (capped for v7x's 64 MiB VMEM).
    wbuf = 1 if weight_kwargs else 2
    vmem_est = (
        2 * tile_b * n_in_p * 2                            # x tile, bf16, 2-buf
        + (2 * tile_b * n_in_p if training else 0)         # mask tile, int8, 2-buf
        + 2 * tile_b * n_out_p * 4                         # out tile, f32, 2-buf
        + wbuf * ((n_in_p * n_hid_p + n_hid_p * n_out_p) * 2
                  + (n_hid_p + n_out_p) * 4)               # weights + biases
        + tile_b * n_hid_p * 4                             # intermediate h
    )
    vmem_limit = int(min(max(2 * vmem_est, 16 * 1024 * 1024), 48 * 1024 * 1024))
    vmem_limit = max(vmem_limit, int(1.25 * vmem_est) + (1 << 20))

    out_p = pl.pallas_call(
        functools.partial(_decoder_kernel, training, 1.0 / (1.0 - p_drop)),
        out_shape=jax.ShapeDtypeStruct((b_pad, n_out_p), jnp.float32),
        grid=grid,
        in_specs=in_specs,
        out_specs=pl.BlockSpec((tile_b, n_out_p), lambda i: (i, 0)),
        compiler_params=pltpu.CompilerParams(
            dimension_semantics=("parallel",),     # batch steps are independent
            vmem_limit_bytes=vmem_limit,
        ),
        cost_estimate=cost,
    )(*inputs)

    return out_p[:B, :n_out]


def decoder_reference(x, w1, b1, w2, b2, mask=None, p_drop=0.2):
    """Pure-JAX reference mirroring the kernel's bf16-operand quantization."""
    f32 = jnp.float32
    xq = x.astype(jnp.bfloat16).astype(f32)
    if mask is not None:
        xq = xq * (mask.astype(f32) * (1.0 / (1.0 - p_drop)))
    xq = xq.astype(jnp.bfloat16).astype(f32)
    w1q = w1.astype(jnp.bfloat16).astype(f32)
    w2q = w2.astype(jnp.bfloat16).astype(f32)
    h = jnp.maximum(xq @ w1q + b1, 0.0)
    hq = h.astype(jnp.bfloat16).astype(f32)
    return hq @ w2q + b2


if __name__ == "__main__":
    # Small shapes implied by the module: Linear(n_bottleneck, n_hidden),
    # Linear(n_hidden, n_output).
    B, n_bottleneck, n_hidden, n_output = 64, 32, 64, 48

    key = jax.random.PRNGKey(0)
    kx, k1, k2, k3, k4 = jax.random.split(key, 5)

    x = jax.random.normal(kx, (B, n_bottleneck), dtype=jnp.float32)

    # Deterministic parameter init (PyTorch-style uniform bounds), stored as
    # [in, out] so the kernel computes x @ W + b.
    lim1 = 1.0 / (n_bottleneck ** 0.5)
    w1 = jax.random.uniform(k1, (n_bottleneck, n_hidden), jnp.float32, -lim1, lim1)
    b1 = jax.random.uniform(k2, (n_hidden,), jnp.float32, -lim1, lim1)
    lim2 = 1.0 / (n_hidden ** 0.5)
    w2 = jax.random.uniform(k3, (n_hidden, n_output), jnp.float32, -lim2, lim2)
    b2 = jax.random.uniform(k4, (n_output,), jnp.float32, -lim2, lim2)

    # One-time parameter prep (padding + bf16 cast hoisted out of the call path).
    params = prepare_decoder_params(w1, b1, w2, b2)

    # Eval-mode forward (dropout = identity). Fall back to default weight
    # buffering if single-buffer pipeline_mode is unavailable on this jax.
    single_buf = True
    try:
        out = jax.block_until_ready(
            decoder_forward(x, params, training=False,
                            single_buffer_weights=single_buf))
    except Exception:
        single_buf = False
        out = jax.block_until_ready(
            decoder_forward(x, params, training=False,
                            single_buffer_weights=single_buf))
    ref = decoder_reference(x, w1, b1, w2, b2)
    assert out.shape == (B, n_output)
    assert jnp.allclose(out, ref, atol=2e-2, rtol=2e-2), \
        float(jnp.max(jnp.abs(out - ref)))

    # Training-mode forward: int8 keep-mask generated from a fixed key, applied
    # in-kernel with a scalar 1/(1-p) scale (PyTorch inverted-dropout semantics;
    # RNG stream differs from torch's).
    drop_key = jax.random.PRNGKey(7)
    out_train = jax.block_until_ready(
        decoder_forward(x, params, training=True, key=drop_key,
                        single_buffer_weights=single_buf))
    keep = jax.random.bernoulli(drop_key, 0.8, x.shape)
    ref_train = decoder_reference(x, w1, b1, w2, b2, mask=keep, p_drop=0.2)
    assert out_train.shape == (B, n_output)
    assert jnp.allclose(out_train, ref_train, atol=2e-2, rtol=2e-2), \
        float(jnp.max(jnp.abs(out_train - ref_train)))

    print("KERNEL_OK")
</pallas_src>

<mosaic_0001>
module attributes {stable_mosaic.version = 11 : i64} {
  func.func @_decoder_kernel(%arg0: i32, %arg1: memref<32x128xbf16, #tpu.memory_space<vmem>>, %arg2: memref<128x128xbf16, #tpu.memory_space<vmem>>, %arg3: memref<1x128xf32, #tpu.memory_space<vmem>>, %arg4: memref<128x128xbf16, #tpu.memory_space<vmem>>, %arg5: memref<1x128xf32, #tpu.memory_space<vmem>>, %arg6: memref<32x128xf32, #tpu.memory_space<vmem>>) attributes {dimension_semantics = [#tpu.dimension_semantics<parallel>], iteration_bounds = array<i64: 2>, scalar_prefetch = 0 : i64, scratch_operands = 0 : i64, tpu.core_type = #tpu.core_type<tc>, window_params = [{transform_indices = @transform_0, window_bounds = array<i64: 32, 128>}, {pipeline_mode = #tpu.pipeline_mode<synchronous>, transform_indices = @transform_1, window_bounds = array<i64: 128, 128>}, {pipeline_mode = #tpu.pipeline_mode<synchronous>, transform_indices = @transform_2, window_bounds = array<i64: 1, 128>}, {pipeline_mode = #tpu.pipeline_mode<synchronous>, transform_indices = @transform_3, window_bounds = array<i64: 128, 128>}, {pipeline_mode = #tpu.pipeline_mode<synchronous>, transform_indices = @transform_4, window_bounds = array<i64: 1, 128>}, {transform_indices = @transform_5, window_bounds = array<i64: 32, 128>}]} {
    %c0 = arith.constant 0 : index
    %c0_0 = arith.constant 0 : index
    %0 = vector.load %arg1[%c0, %c0_0] : memref<32x128xbf16, #tpu.memory_space<vmem>>, vector<32x128xbf16>
    %c0_1 = arith.constant 0 : index
    %c0_2 = arith.constant 0 : index
    %1 = vector.load %arg2[%c0_1, %c0_2] : memref<128x128xbf16, #tpu.memory_space<vmem>>, vector<128x128xbf16>
    %cst = arith.constant dense<0.000000e+00> : vector<32x128xf32>
    %2 = tpu.matmul %0, %1, %cst {dimension_numbers = #tpu.dot_dimension_numbers<[1], [0], [0], [1], [0, 0, 1, 1], [], []>} : vector<32x128xbf16>, vector<128x128xbf16>, vector<32x128xf32> -> vector<32x128xf32>
    %c0_3 = arith.constant 0 : index
    %c0_4 = arith.constant 0 : index
    %3 = vector.load %arg3[%c0_3, %c0_4] : memref<1x128xf32, #tpu.memory_space<vmem>>, vector<1x128xf32>
    %4 = vector.broadcast %3 : vector<1x128xf32> to vector<32x128xf32>
    %5 = arith.addf %2, %4 : vector<32x128xf32>
    %cst_5 = arith.constant 0.000000e+00 : f32
    %6 = vector.broadcast %cst_5 : f32 to vector<32x128xf32>
    %7 = arith.maximumf %5, %6 : vector<32x128xf32>
    %8 = arith.truncf %7 : vector<32x128xf32> to vector<32x128xbf16>
    %c0_6 = arith.constant 0 : index
    %c0_7 = arith.constant 0 : index
    %9 = vector.load %arg4[%c0_6, %c0_7] : memref<128x128xbf16, #tpu.memory_space<vmem>>, vector<128x128xbf16>
    %cst_8 = arith.constant dense<0.000000e+00> : vector<32x128xf32>
    %10 = tpu.matmul %8, %9, %cst_8 {dimension_numbers = #tpu.dot_dimension_numbers<[1], [0], [0], [1], [0, 0, 1, 1], [], []>} : vector<32x128xbf16>, vector<128x128xbf16>, vector<32x128xf32> -> vector<32x128xf32>
    %c0_9 = arith.constant 0 : index
    %c0_10 = arith.constant 0 : index
    %11 = vector.load %arg5[%c0_9, %c0_10] : memref<1x128xf32, #tpu.memory_space<vmem>>, vector<1x128xf32>
    %12 = vector.broadcast %11 : vector<1x128xf32> to vector<32x128xf32>
    %13 = arith.addf %10, %12 : vector<32x128xf32>
    %c0_11 = arith.constant 0 : index
    %c0_12 = arith.constant 0 : index
    %14 = vector.load %arg6[%c0_11, %c0_12] : memref<32x128xf32, #tpu.memory_space<vmem>>, vector<32x128xf32>
    tpu.vector_store %arg6[%c0_11, %c0_12], %13 {strides = array<i32>} : memref<32x128xf32, #tpu.memory_space<vmem>>, vector<32x128xf32>,
    return
  }
  func.func @transform_0(%arg0: i32) -> (i32, i32) {
    %c0_i32 = arith.constant 0 : i32
    %c0_i32_0 = arith.constant 0 : i32
    return %arg0, %c0_i32 : i32, i32
  }
  func.func @transform_1(%arg0: i32) -> (i32, i32) {
    %c0_i32 = arith.constant 0 : i32
    %c0_i32_0 = arith.constant 0 : i32
    %c0_i32_1 = arith.constant 0 : i32
    return %c0_i32, %c0_i32_0 : i32, i32
  }
  func.func @transform_2(%arg0: i32) -> (i32, i32) {
    %c0_i32 = arith.constant 0 : i32
    %c0_i32_0 = arith.constant 0 : i32
    %c0_i32_1 = arith.constant 0 : i32
    return %c0_i32, %c0_i32_0 : i32, i32
  }
  func.func @transform_3(%arg0: i32) -> (i32, i32) {
    %c0_i32 = arith.constant 0 : i32
    %c0_i32_0 = arith.constant 0 : i32
    %c0_i32_1 = arith.constant 0 : i32
    return %c0_i32, %c0_i32_0 : i32, i32
  }
  func.func @transform_4(%arg0: i32) -> (i32, i32) {
    %c0_i32 = arith.constant 0 : i32
    %c0_i32_0 = arith.constant 0 : i32
    %c0_i32_1 = arith.constant 0 : i32
    return %c0_i32, %c0_i32_0 : i32, i32
  }
  func.func @transform_5(%arg0: i32) -> (i32, i32) {
    %c0_i32 = arith.constant 0 : i32
    %c0_i32_0 = arith.constant 0 : i32
    return %arg0, %c0_i32 : i32, i32
  }
}

module attributes {stable_mosaic.version = 11 : i64} {
  func.func @_decoder_kernel(%arg0: i32, %arg1: memref<32x128xbf16, #tpu.memory_space<vmem>>, %arg2: memref<128x128xbf16, #tpu.memory_space<vmem>>, %arg3: memref<1x128xf32, #tpu.memory_space<vmem>>, %arg4: memref<128x128xbf16, #tpu.memory_space<vmem>>, %arg5: memref<1x128xf32, #tpu.memory_space<vmem>>, %arg6: memref<32x128xf32, #tpu.memory_space<vmem>>) attributes {dimension_semantics = [#tpu.dimension_semantics<parallel>], iteration_bounds = array<i64: 2>, scalar_prefetch = 0 : i64, scratch_operands = 0 : i64, tpu.core_type = #tpu.core_type<tc>, window_params = [{transform_indices = @transform_0, window_bounds = array<i64: 32, 128>}, {pipeline_mode = #tpu.pipeline_mode<synchronous>, transform_indices = @transform_1, window_bounds = array<i64: 128, 128>}, {pipeline_mode = #tpu.pipeline_mode<synchronous>, transform_indices = @transform_2, window_bounds = array<i64: 1, 128>}, {pipeline_mode = #tpu.pipeline_mode<synchronous>, transform_indices = @transform_3, window_bounds = array<i64: 128, 128>}, {pipeline_mode = #tpu.pipeline_mode<synchronous>, transform_indices = @transform_4, window_bounds = array<i64: 1, 128>}, {transform_indices = @transform_5, window_bounds = array<i64: 32, 128>}]} {
    %c0 = arith.constant 0 : index
    %c0_0 = arith.constant 0 : index
    %0 = vector.load %arg1[%c0, %c0_0] : memref<32x128xbf16, #tpu.memory_space<vmem>>, vector<32x128xbf16>
    %c0_1 = arith.constant 0 : index
    %c0_2 = arith.constant 0 : index
    %1 = vector.load %arg2[%c0_1, %c0_2] : memref<128x128xbf16, #tpu.memory_space<vmem>>, vector<128x128xbf16>
    %cst = arith.constant dense<0.000000e+00> : vector<32x128xf32>
    %2 = tpu.matmul %0, %1, %cst {dimension_numbers = #tpu.dot_dimension_numbers<[1], [0], [0], [1], [0, 0, 1, 1], [], []>} : vector<32x128xbf16>, vector<128x128xbf16>, vector<32x128xf32> -> vector<32x128xf32>
    %c0_3 = arith.constant 0 : index
    %c0_4 = arith.constant 0 : index
    %3 = vector.load %arg3[%c0_3, %c0_4] : memref<1x128xf32, #tpu.memory_space<vmem>>, vector<1x128xf32>
    %4 = vector.broadcast %3 : vector<1x128xf32> to vector<32x128xf32>
    %5 = arith.addf %2, %4 : vector<32x128xf32>
    %cst_5 = arith.constant 0.000000e+00 : f32
    %6 = vector.broadcast %cst_5 : f32 to vector<32x128xf32>
    %7 = arith.maximumf %5, %6 : vector<32x128xf32>
    %8 = arith.truncf %7 : vector<32x128xf32> to vector<32x128xbf16>
    %c0_6 = arith.constant 0 : index
    %c0_7 = arith.constant 0 : index
    %9 = vector.load %arg4[%c0_6, %c0_7] : memref<128x128xbf16, #tpu.memory_space<vmem>>, vector<128x128xbf16>
    %cst_8 = arith.constant dense<0.000000e+00> : vector<32x128xf32>
    %10 = tpu.matmul %8, %9, %cst_8 {dimension_numbers = #tpu.dot_dimension_numbers<[1], [0], [0], [1], [0, 0, 1, 1], [], []>} : vector<32x128xbf16>, vector<128x128xbf16>, vector<32x128xf32> -> vector<32x128xf32>
    %c0_9 = arith.constant 0 : index
    %c0_10 = arith.constant 0 : index
    %11 = vector.load %arg5[%c0_9, %c0_10] : memref<1x128xf32, #tpu.memory_space<vmem>>, vector<1x128xf32>
    %12 = vector.broadcast %11 : vector<1x128xf32> to vector<32x128xf32>
    %13 = arith.addf %10, %12 : vector<32x128xf32>
    %c0_11 = arith.constant 0 : index
    %c0_12 = arith.constant 0 : index
    %14 = vector.load %arg6[%c0_11, %c0_12] : memref<32x128xf32, #tpu.memory_space<vmem>>, vector<32x128xf32>
    tpu.vector_store %arg6[%c0_11, %c0_12], %13 {strides = array<i32>} : memref<32x128xf32, #tpu.memory_space<vmem>>, vector<32x128xf32>,
    return
  }
  func.func @transform_0(%arg0: i32) -> (i32, i32) {
    %c0_i32 = arith.constant 0 : i32
    %c0_i32_0 = arith.constant 0 : i32
    return %arg0, %c0_i32 : i32, i32
  }
  func.func @transform_1(%arg0: i32) -> (i32, i32) {
    %c0_i32 = arith.constant 0 : i32
    %c0_i32_0 = arith.constant 0 : i32
    %c0_i32_1 = arith.constant 0 : i32
    return %c0_i32, %c0_i32_0 : i32, i32
  }
  func.func @transform_2(%arg0: i32) -> (i32, i32) {
    %c0_i32 = arith.constant 0 : i32
    %c0_i32_0 = arith.constant 0 : i32
    %c0_i32_1 = arith.constant 0 : i32
    return %c0_i32, %c0_i32_0 : i32, i32
  }
  func.func @transform_3(%arg0: i32) -> (i32, i32) {
    %c0_i32 = arith.constant 0 : i32
    %c0_i32_0 = arith.constant 0 : i32
    %c0_i32_1 = arith.constant 0 : i32
    return %c0_i32, %c0_i32_0 : i32, i32
  }
  func.func @transform_4(%arg0: i32) -> (i32, i32) {
    %c0_i32 = arith.constant 0 : i32
    %c0_i32_0 = arith.constant 0 : i32
    %c0_i32_1 = arith.constant 0 : i32
    return %c0_i32, %c0_i32_0 : i32, i32
  }
  func.func @transform_5(%arg0: i32) -> (i32, i32) {
    %c0_i32 = arith.constant 0 : i32
    %c0_i32_0 = arith.constant 0 : i32
    return %arg0, %c0_i32 : i32, i32
  }
}

</mosaic_0001>

<bundles_post_ra>
// kernel: tpu_custom_call.1
= control target key start
LH: loop header
LB: loop body
LE: loop exit
PB: predicated region body
PF: predicated region fallthrough
CT: control target
= control target key end

     0   :  { %10 = vsyncpa [#allocation3], 0  ;;  %s1232_s0 = inlined_call_operand.hbm [shape: bf16[64,128], index: 0, kind: input, shape index: {}]   ;;  %s1233_s1 = inlined_call_operand.hbm [shape: bf16[128,128], index: 1, kind: input, shape index: {}]   ;;  %s1234_s2 = inlined_call_operand.vmem [shape: f32[1,128], index: 2, kind: input, shape index: {}]   ;;  %s1235_s3 = inlined_call_operand.hbm [shape: bf16[128,128], index: 3, kind: input, shape index: {}]   ;;  %s1236_s4 = inlined_call_operand.vmem [shape: f32[1,128], index: 4, kind: input, shape index: {}]   ;;  %s1237_s5 = inlined_call_operand.hbm [shape: f32[64,128], index: 5, kind: output, shape index: {}]  }
   0x1   :  { %12 = vsyncpa [#allocation3 + $0x1], 0 }
   0x2   :  { %13 = vsyncpa [#allocation6], 0 }
   0x3   :  { %14 = vsyncpa [#allocation4], 0 }
   0x4   :  { %16 = vsyncpa [#allocation4 + $0x1], 0  ;;  %s1024_s18 = smov 0   ;;  %s1026_s19 = smov 0  }
   0x5   :  { %s1028_s20 = smov 0   ;;  %s1030_s21 = smov 0  }
   0x6 LB: > { %s1045_s22 = sadd.s32 4294967295, %s984_s21   ;;  %s647_s23 = sadd.s32 4294967294, %s984_s21   ;;  %s984_s21 = sphi %s1030_s21, %s1260_s21   ;;  %s980_s20 = sphi %s1028_s20, %s1259_s20   ;;  %s976_s19 = sphi %s1026_s19, %s1258_s19   ;;  %s972_s18 = sphi %s1024_s18, %s1257_s18  }
   0x7   : > { %p42_p0 = scmp.ne.s32.totalorder %s976_s19, %s972_s18  ;;  %p1238_p1 = scmp.eq.s32.totalorder %s1045_s22, 0 }
   0x8   : > { %p150_p2 = scmp.eq.s32.totalorder %s1045_s22, 1  ;;  %p156_p3 = scmp.eq.s32.totalorder %s647_s23, 1 }
   0x9   : > { %p1054_p4 = por %p1238_p1, %p42_p0  ;;  %p648_p5 = scmp.ge.s32.totalorder %s984_s21, 1 }
   0xa   : > { %p1059_p6 = por %p156_p3, %p42_p0  ;;  %p163_p7 = scmp.lt.s32.totalorder %s984_s21, 3 }
   0xb   : > { %s1243_s24 = scalar_select %p1054_p4, 1, 0 }
   0xc   : > { %s1244_s25 = scalar_select %p1059_p6, 1, 0 }
   0xd   : > { %p1064_p8 = pnand %p648_p5, %p163_p7  ;;  %s986_s27 = smov [#allocation5]  }
   0xe   : > { %s175_s28 = sshll.u32 %s986_s27, 4  ;;  %s987_s30 = smov [#allocation7]   ;;  %s176_s28 = int_to_ptr.vmem [resolvable:$true] %s175_s28 }
   0xf   : > { %s1245_s26 = scalar_select %p1064_p8, 1, 0 }
  0x10   : > { %p759_p9 = pneg %p1064_p8  ;;  %s191_s6 = sshll.u32 %s987_s30, 4  ;;  %s192_s6 = int_to_ptr.vmem [resolvable:$true] %s191_s6 }
  0x11   : > { %s847_s7 = scalar_lea.vmem %s176_s28, 1024  ;;  %p855_p5 = scmp.lt.s32.totalorder %s176_s28, %s176_s28 }
  0x12   : > { %p1073_p11 = pnand %p759_p9, %p1238_p1  ;;  %p848_p13 = scmp.ne.s32.totalorder %s176_s28, %s847_s7 }
  0x13   : > { %p856_p7 = scmp.lt.s32.totalorder %s847_s7, %s847_s7 }
  0x14   : > { %p838_p12 = pneg %p1073_p11 }
  0x15   : > { %p857_p10 = por %p856_p7, %p855_p5 }
  0x16   : > { %p850_p0 = pnand %p848_p13, %p838_p12 }
  0x18   : > { %p851_p3 = pneg %p850_p0 }
  0x1a   : > { %p858_p9 = pnand %p857_p10, %p851_p3 }
  0x1c   : > { %861 = shalt.err (!%p858_p9)
}
  0x1d   : > { %s1239_s8 = smov 64   ;;  %s989_s9 = smov 4  }
  0x1e   : > { %762 = dma.hbm_to_vmem [thread:$0]  (!%p1073_p11), %s1233_s1, 1024, %s176_s28, [#allocation6], %s1239_s8, %s1239_s8, %s989_s9  }
  0x1f   : > { %s873_s12 = scalar_lea.vmem %s192_s6, 1024  ;;  %p881_p10 = scmp.lt.s32.totalorder %s192_s6, %s192_s6 }
  0x20   : > { %p874_p13 = scmp.ne.s32.totalorder %s192_s6, %s873_s12  ;;  %p882_p3 = scmp.lt.s32.totalorder %s873_s12, %s873_s12 }
  0x22   : > { %p876_p0 = pnand %p874_p13, %p838_p12  ;;  %p883_p7 = por %p882_p3, %p881_p10 }
  0x24   : > { %p877_p5 = pneg %p876_p0 }
  0x26   : > { %p884_p9 = pnand %p883_p7, %p877_p5 }
  0x28   : > { %887 = shalt.err (!%p884_p9)
}
  0x29   : > { %765 = dma.hbm_to_vmem [thread:$0]  (!%p1073_p11), %s1235_s3, 1024, %s192_s6, [#allocation6], %s1239_s8, %s1239_s8, %s989_s9  }
  0x2a   : > { %s1102_s15 = sadd.s32 1, %s984_s21   ;;  %s29_s16 = sadd.s32 1, %s980_s20 }
  0x2b   : > { %s26_s17 = ssub.s32 %s984_s21, %s1102_s15  ;;  %p36_p12 = scmp.ne.s32.totalorder %s980_s20, %s976_s19 }
  0x2c   : > { %p27_p13 = scmp.eq.s32.totalorder %s26_s17, 0  ;;  %p37_p0 = scmp.eq.s32.totalorder %s984_s21, 0 }
  0x2d   : > { %p1112_p5 = por %p150_p2, %p36_p12  ;;  %p776_p10 = scmp.lt.s32.totalorder %s984_s21, 2 }
  0x2e   : > { %s1118_s27 = scalar_select %p27_p13, %s980_s20, %s29_s16  }
  0x2f   : > { %s1247_s23 = scalar_select %p1112_p5, 1, 0 }
  0x30   : > { %p38_p3 = por %p37_p0, %p36_p12  ;;  %s208_s28 = sand.u32 1, %s980_s20  }
  0x31   : > { %s652_s29 = sshll.u32 %s208_s28, 4  ;;  %s685_s30 = sshll.u32 %s984_s21, 8 }
  0x32   : > { %s1125_s10 = scalar_lea.hbm %s1232_s0, %s685_s30  ;;  %s212_s11 = scalar_lea.vmem [#allocation2], %s652_s29 }
  0x33   : > { %s219_s12 = sshll.u32 %s212_s11, 4  ;;  %p1129_p2 = pnand %p776_p10, %p38_p3  ;;  %s1127_s12 = int_to_ptr.vmem [resolvable:$true] %s219_s12 }
  0x34   : > { %s1133_s14 = scalar_lea.sflag [#allocation3], %s208_s28  ;;  %s888_s16 = scalar_lea.hbm %s1125_s10, 256 }
  0x35   : > { %p889_p11 = scmp.ne.s32.totalorder %s1125_s10, %s888_s16  ;;  %p890_p7 = pneg %p1129_p2 }
  0x36   : > { %s893_s29 = scalar_lea.hbm %s1232_s0, 512  ;;  %p894_p13 = scmp.lt.s32.totalorder %s1125_s10, %s1232_s0 }
  0x37   : > { %p891_p9 = pnand %p890_p7, %p889_p11  ;;  %p895_p0 = scmp.lt.s32.totalorder %s893_s29, %s888_s16 }
  0x39   : > { %p892_p12 = pneg %p891_p9  ;;  %p896_p10 = por %p895_p0, %p894_p13 }
  0x3b   : > { %p897_p3 = pnand %p896_p10, %p892_p12 }
  0x3d   : > { %900 = shalt.err (!%p897_p3)
}
  0x3e   : > { %s901_s28 = scalar_lea.vmem %s1127_s12, 256  ;;  %s990_s11 = smov [#allocation2]  }
  0x3f   : > { %p902_p1 = scmp.ne.s32.totalorder %s1127_s12, %s901_s28  ;;  %s906_s8 = sshll.u32 %s990_s11, 4  ;;  %s907_s8 = int_to_ptr.vmem [resolvable:$false] %s906_s8 }
  0x40   : > { %s908_s17 = scalar_lea.vmem %s907_s8, 512  ;;  %p909_p9 = scmp.lt.s32.totalorder %s1127_s12, %s907_s8 }
  0x41   : > { %p904_p6 = pnand %p902_p1, %p890_p7  ;;  %p910_p5 = scmp.lt.s32.totalorder %s908_s17, %s901_s28 }
  0x43   : > { %p905_p11 = pneg %p904_p6  ;;  %p911_p4 = por %p910_p5, %p909_p9 }
  0x45   : > { %p912_p8 = pnand %p911_p4, %p905_p11 }
  0x47   : > { %915 = shalt.err (!%p912_p8)
}
  0x48   : > { %s1249_s16 = smov 64   ;;  %p1250_p1 = scmp.ne.s32.totalorder %s1245_s26, 0 }
  0x49   : > { %769 = dma.hbm_to_vmem [thread:$0]  (!%p1129_p2), %s1125_s10, 256, %s1127_s12, %s1133_s14, %s1249_s16, %s1249_s16, %s989_s9  }
  0x4a   : > { %231 = sbr.rel (%p1250_p1) target bundleno = 537 (0x219), region = 40  ;;  %s1160_s30 = sand.u32 (!%p1250_p1), 1, %s976_s19  }
  0x4b   : > { %s656_s8 = sshll.u32 (!%p1250_p1), %s1160_s30, 4  ;;  %s234_s29 = scalar_lea.sflag (!%p1250_p1), [#allocation3], %s1160_s30 }
  0x4c   : > { %s1164_s6 = scalar_lea.vmem (!%p1250_p1), [#allocation2], %s656_s8  ;;  %p1251_p4 = scmp.ne.s32.totalorder (!%p1250_p1), %s1243_s24, 0 }
  0x4f   : > { %959 = dma.done.wait (%p1251_p4), %s234_s29, 256  }
  0x50   : > { %961 = vsyncadd (%p1251_p4), %s234_s29, 4294967040  ;;  %p1252_p6 = scmp.eq.s32.totalorder %s1045_s22, 0 }
  0x52   : > { %963 = dma.done.wait (%p1252_p6), [#allocation6], 2048   ;;  %p1253_p8 = pmov %p1252_p6 }
  0x53   : > { %v818_v0 = vld [vmem:[#allocation5 + $0x38] sm:$0xff]   ;;  %v819_v1 = vld [vmem:[#allocation5 + $0x30] sm:$0xff]   ;;  %v820_v2 = vld [vmem:[#allocation5 + $0x28] sm:$0xff]   ;;  %s659_s9 = sshll.u32 %s1160_s30, 5  ;;  %s686_s7 = sshll.u32 %s1045_s22, 9 }
  0x54   : > { %965 = vsyncadd (%p1253_p8), [#allocation6], 4294965248  ;;  %707 = vmatprep.subr.bf16.mxu0 %v818_v0  ;;  %v821_v3 = vld [vmem:[#allocation5 + $0x20] sm:$0xff]   ;;  %v828_v5 = vld [vmem:[#allocation7 + $0x38] sm:$0xff]   ;;  %s271_s13 = scalar_lea.vmem [#allocation8], %s659_s9  ;;  %s1189_s17 = scalar_lea.hbm %s1237_s5, %s686_s7 }
  0x55   : > { %708 = vmatpush3.bf16.msra.mxu0 %v818_v0  ;;  %v826_v4 = vld [vmem:[%s1164_s6] sm:$0xff]   ;;  %v822_v7 = vld [vmem:[#allocation5 + $0x18] sm:$0xff]   ;;  %727 = vmatprep.subr.bf16.mxu1 %v828_v5  ;;  %v830_v9 = vld [vmem:[#allocation7 + $0x28] sm:$0xff]   ;;  %s555_s14 = sshll.u32 %s271_s13, 4  ;;  %s542_s16 = scalar_lea.sflag [#allocation4], %s1160_s30  ;;  %s1184_s14 = int_to_ptr.vmem [resolvable:$true] %s555_s14 }
  0x56   : > { %709 = vmatprep.subr.bf16.mxu0 %v819_v1  ;;  %723 = vmatprep.mubr.bf16.mxu0 %v826_v4  ;;  %v829_v6 = vld [vmem:[#allocation7 + $0x30] sm:$0xff]   ;;  %v831_v10 = vld [vmem:[#allocation7 + $0x20] sm:$0xff]   ;;  %v824_v11 = vld [vmem:[#allocation5 + $0x8] sm:$0xff]   ;;  %s916_s8 = scalar_lea.vmem %s1184_s14, 512  ;;  %p1254_p2 = scmp.ne.s32.totalorder %s1247_s23, 0 }
  0x57   : > { %728 = vmatpush3.bf16.msra.mxu1 %v828_v5  ;;  %v823_v8 = vld [vmem:[#allocation5 + $0x10] sm:$0xff]   ;;  %v832_v12 = vld [vmem:[#allocation7 + $0x18] sm:$0xff]   ;;  %v825_v13 = vld [vmem:[#allocation5] sm:$0xff]   ;;  %p917_p5 = scmp.ne.s32.totalorder %s1184_s14, %s916_s8  ;;  %s991_s22 = smov [#allocation8]  }
  0x58   : > { %729 = vmatprep.subr.bf16.mxu1 %v829_v6  ;;  %v827_v14 = vld [vmem:[%s1164_s6 + $0x8] sm:$0xff]   ;;  %v833_v15 = vld [vmem:[#allocation7 + $0x10] sm:$0xff]   ;;  %v835_v17 = vld [vmem:[#allocation7] sm:$0xff]   ;;  %s920_s29 = sshll.u32 %s991_s22, 4  ;;  %s921_s29 = int_to_ptr.vmem [resolvable:$false] %s920_s29 }
  0x59   : > { %710 = vmatpush3.bf16.msra.mxu0 %v819_v1  ;;  %v834_v16 = vld [vmem:[#allocation7 + $0x8] sm:$0xff]   ;;  %v660_v20 = vld [vmem:[%s1234_s2] ss:$0 sm:$0xff]  ;;  %p918_p7 = pnand %p917_p5, %p1254_p2  ;;  %s922_s6 = scalar_lea.vmem %s921_s29, 1024 }
  0x5a   : > { %711 = vmatprep.subr.bf16.mxu0 %v820_v2  ;;  %v671_v33 = vld [vmem:[%s1236_s4] ss:$0 sm:$0xff]  ;;  %p923_p13 = scmp.lt.s32.totalorder %s1184_s14, %s921_s29  ;;  %p924_p0 = scmp.lt.s32.totalorder %s922_s6, %s916_s8 }
  0x5b   : > { %730 = vmatpush3.bf16.msra.mxu1 %v829_v6  ;;  %p919_p12 = pneg %p918_p7 }
  0x5c   : > { %731 = vmatprep.subr.bf16.mxu1 %v830_v9  ;;  %p925_p10 = por %p924_p0, %p923_p13 }
  0x5d   : > { %712 = vmatpush3.bf16.msra.mxu0 %v820_v2 }
  0x5e   : > { %713 = vmatprep.subr.bf16.mxu0 %v821_v3  ;;  %p926_p3 = pnand %p925_p10, %p919_p12 }
  0x5f   : > { %732 = vmatpush3.bf16.msra.mxu1 %v830_v9 }
  0x60   : > { %733 = vmatprep.subr.bf16.mxu1 %v831_v10 }
  0x61   : > { %714 = vmatpush3.bf16.msra.mxu0 %v821_v3 }
  0x62   : > { %715 = vmatprep.subr.bf16.mxu0 %v822_v7 }
  0x63   : > { %734 = vmatpush3.bf16.msra.mxu1 %v831_v10 }
  0x64   : > { %735 = vmatprep.subr.bf16.mxu1 %v832_v12 }
  0x65   : > { %716 = vmatpush3.bf16.msra.mxu0 %v822_v7 }
  0x66   : > { %717 = vmatprep.subr.bf16.mxu0 %v823_v8 }
  0x67   : > { %736 = vmatpush3.bf16.msra.mxu1 %v832_v12 }
  0x68   : > { %737 = vmatprep.subr.bf16.mxu1 %v833_v15 }
  0x69   : > { %718 = vmatpush3.bf16.msra.mxu0 %v823_v8 }
  0x6a   : > { %719 = vmatprep.subr.bf16.mxu0 %v824_v11 }
  0x6b   : > { %738 = vmatpush3.bf16.msra.mxu1 %v833_v15 }
  0x6c   : > { %739 = vmatprep.subr.bf16.mxu1 %v834_v16 }
  0x6d   : > { %720 = vmatpush3.bf16.msra.mxu0 %v824_v11 }
  0x6e   : > { %721 = vmatprep.subr.bf16.mxu0 %v825_v13 }
  0x6f   : > { %740 = vmatpush3.bf16.msra.mxu1 %v834_v16 }
  0x70   : > { %741 = vmatprep.subr.bf16.mxu1 %v835_v17 }
  0x71   : > { %722 = vmatpush3.bf16.msra.mxu0 %v825_v13 }
  0x73   : > { %742 = vmatpush3.bf16.msra.mxu1 %v835_v17 }
  0x74   : > { %724 = vmatmul.mubr.bf16.vlgmr.msra.gmra.mxu0 %v827_v14 }
 0x134   : > { %v725_v18 = vpop.f32.mrf.mxu0 }
 0x135   : > { %v405_v24 = vadd.f32 %v725_v18, %v660_v20 }
 0x136   : > { %v396_v19 = vpop.f32.mrf.mxu0 }
 0x137   : > { %v397_v22 = vadd.f32 %v660_v20, %v396_v19  ;;  %v413_v30 = vmax.f32 %v405_v24, 0.0 }
 0x138   : > { %v726_v21 = vpop.f32.mrf.mxu0 }
 0x139   : > { %v408_v23 = vadd.f32 %v726_v21, %v660_v20  ;;  %v411_v28 = vmax.f32 %v397_v22, 0.0 }
 0x13a   : > { %v399_v25 = vpop.f32.mrf.mxu0 }
 0x13b   : > { %v400_v26 = vadd.f32 %v660_v20, %v399_v25  ;;  %v414_v27 = vmax.f32 %v408_v23, 0.0 }
 0x13d   : > { %v412_v29 = vmax.f32 %v400_v26, 0.0  ;;  %v416_v32 = vpack.c.bf16 %v414_v27, %v413_v30 }
 0x13f   : > { %v415_v31 = vpack.c.bf16 %v412_v29, %v411_v28 }
 0x141   : > { %743 = vmatprep.mubr.bf16.mxu1 %v415_v31 }
 0x142   : > { %744 = vmatmul.mubr.bf16.vlgmr.msra.gmra.mxu1 %v416_v32 }
 0x202   : > { %v745_v34 = vpop.f32.mrf.mxu1 }
 0x203   : > { %v531_v35 = vadd.f32 %v745_v34, %v671_v33 }
 0x204   : > { %v522_v36 = vpop.f32.mrf.mxu1 }
 0x205   : > { %539 = vst [vmem:[%s271_s13 + $0x10] sm:$0xff] %v531_v35  ;;  %v523_v37 = vadd.f32 %v671_v33, %v522_v36 }
 0x206   : > { %v746_v38 = vpop.f32.mrf.mxu1 }
 0x207   : > { %537 = vst [vmem:[%s271_s13] sm:$0xff] %v523_v37  ;;  %v534_v39 = vadd.f32 %v746_v38, %v671_v33 }
 0x208   : > { %v525_v40 = vpop.f32.mrf.mxu1 }
 0x209   : > { %540 = vst [vmem:[%s271_s13 + $0x18] sm:$0xff] %v534_v39  ;;  %v526_v41 = vadd.f32 %v671_v33, %v525_v40 }
 0x20b   : > { %538 = vst [vmem:[%s271_s13 + $0x8] sm:$0xff] %v526_v41 }
 0x20c   : > { %929 = shalt.err (!%p926_p3)
}
 0x20d   : > { %s930_s24 = scalar_lea.hbm %s1189_s17, 512  ;;  %s934_s10 = scalar_lea.hbm %s1237_s5, 1024 }
 0x20e   : > { %p931_p11 = scmp.ne.s32.totalorder %s1189_s17, %s930_s24  ;;  %p935_p4 = scmp.lt.s32.totalorder %s1189_s17, %s1237_s5 }
 0x20f   : > { %p936_p6 = scmp.lt.s32.totalorder %s934_s10, %s930_s24 }
 0x210   : > { %p932_p9 = pnand %p931_p11, %p1254_p2 }
 0x211   : > { %p937_p8 = por %p936_p6, %p935_p4 }
 0x212   : > { %p933_p1 = pneg %p932_p9 }
 0x214   : > { %p938_p5 = pnand %p937_p8, %p933_p1 }
 0x216   : > { %941 = shalt.err (!%p938_p5)
}
 0x217   : > { %s992_s7 = smov 128   ;;  %s993_s28 = smov 8  }
 0x218   : > { %757 = dma.vmem_to_hbm [thread:$0]  (%p1254_p2), %s1184_s14, 512, %s1189_s17, %s542_s16, %s992_s7, %s992_s7, %s993_s28  }
 0x219 PF: > { %s570_s11 = sand.u32 1, %s972_s18   ;;  %p1255_p7 = scmp.ne.s32.totalorder %s1244_s25, 0 }
 0x21a   : > { %p1256_p12 = scmp.ge.s32.totalorder %s984_s21, 2  ;;  %s571_s8 = scalar_lea.sflag [#allocation4], %s570_s11 }
 0x21c   : > { %p771_p13 = pnand %p1256_p12, %p1255_p7 }
 0x21e   : > { %p772_p0 = pneg %p771_p13 }
 0x220   : > { %967 = dma.done.wait (%p772_p0), %s571_s8, 512  }
 0x221   : > { %969 = vsyncadd (%p772_p0), %s571_s8, 4294966784  ;;  %p19_p10 = scmp.ge.s32.totalorder %s1102_s15, 4   ;;  %s1257_s18 = smov %s976_s19 }
 0x222   : > { %s1258_s19 = smov %s980_s20  ;;  %s1259_s20 = smov %s1118_s27 }
 0x223   : > { %s1260_s21 = smov %s1102_s15  ;;  %21 = sbr.rel (!%p19_p10) target bundleno = 6 (0x6), region = 93 }
 0x228   :  { %576 = vsyncpa [#allocation3], 1 }
 0x229   :  { %578 = vsyncpa [#allocation3 + $0x1], 1 }
 0x22a   :  { %579 = vsyncpa [#allocation6], 1 }
 0x22b   :  { %580 = vsyncpa [#allocation4], 1 }
 0x22c   :  { %582 = vsyncpa [#allocation4 + $0x1], 1 }

// kernel: tpu_custom_call.1
= control target key start
LH: loop header
LB: loop body
LE: loop exit
PB: predicated region body
PF: predicated region fallthrough
CT: control target
= control target key end

     0   :  { %10 = vsyncpa [#allocation3], 0  ;;  %s1232_s0 = inlined_call_operand.hbm [shape: bf16[64,128], index: 0, kind: input, shape index: {}]   ;;  %s1233_s1 = inlined_call_operand.hbm [shape: bf16[128,128], index: 1, kind: input, shape index: {}]   ;;  %s1234_s2 = inlined_call_operand.vmem [shape: f32[1,128], index: 2, kind: input, shape index: {}]   ;;  %s1235_s3 = inlined_call_operand.hbm [shape: bf16[128,128], index: 3, kind: input, shape index: {}]   ;;  %s1236_s4 = inlined_call_operand.vmem [shape: f32[1,128], index: 4, kind: input, shape index: {}]   ;;  %s1237_s5 = inlined_call_operand.hbm [shape: f32[64,128], index: 5, kind: output, shape index: {}]  }
   0x1   :  { %12 = vsyncpa [#allocation3 + $0x1], 0 }
   0x2   :  { %13 = vsyncpa [#allocation6], 0 }
   0x3   :  { %14 = vsyncpa [#allocation4], 0 }
   0x4   :  { %16 = vsyncpa [#allocation4 + $0x1], 0  ;;  %s1024_s18 = smov 0   ;;  %s1026_s19 = smov 0  }
   0x5   :  { %s1028_s20 = smov 0   ;;  %s1030_s21 = smov 0  }
   0x6 LB: > { %s1045_s22 = sadd.s32 4294967295, %s984_s21   ;;  %s647_s23 = sadd.s32 4294967294, %s984_s21   ;;  %s984_s21 = sphi %s1030_s21, %s1260_s21   ;;  %s980_s20 = sphi %s1028_s20, %s1259_s20   ;;  %s976_s19 = sphi %s1026_s19, %s1258_s19   ;;  %s972_s18 = sphi %s1024_s18, %s1257_s18  }
   0x7   : > { %p42_p0 = scmp.ne.s32.totalorder %s976_s19, %s972_s18  ;;  %p1238_p1 = scmp.eq.s32.totalorder %s1045_s22, 0 }
   0x8   : > { %p150_p2 = scmp.eq.s32.totalorder %s1045_s22, 1  ;;  %p156_p3 = scmp.eq.s32.totalorder %s647_s23, 1 }
   0x9   : > { %p1054_p4 = por %p1238_p1, %p42_p0  ;;  %p648_p5 = scmp.ge.s32.totalorder %s984_s21, 1 }
   0xa   : > { %p1059_p6 = por %p156_p3, %p42_p0  ;;  %p163_p7 = scmp.lt.s32.totalorder %s984_s21, 3 }
   0xb   : > { %s1243_s24 = scalar_select %p1054_p4, 1, 0 }
   0xc   : > { %s1244_s25 = scalar_select %p1059_p6, 1, 0 }
   0xd   : > { %p1064_p8 = pnand %p648_p5, %p163_p7  ;;  %s986_s27 = smov [#allocation5]  }
   0xe   : > { %s175_s28 = sshll.u32 %s986_s27, 4  ;;  %s987_s30 = smov [#allocation7]   ;;  %s176_s28 = int_to_ptr.vmem [resolvable:$true] %s175_s28 }
   0xf   : > { %s1245_s26 = scalar_select %p1064_p8, 1, 0 }
  0x10   : > { %p759_p9 = pneg %p1064_p8  ;;  %s191_s6 = sshll.u32 %s987_s30, 4  ;;  %s192_s6 = int_to_ptr.vmem [resolvable:$true] %s191_s6 }
  0x11   : > { %s847_s7 = scalar_lea.vmem %s176_s28, 1024  ;;  %p855_p5 = scmp.lt.s32.totalorder %s176_s28, %s176_s28 }
  0x12   : > { %p1073_p11 = pnand %p759_p9, %p1238_p1  ;;  %p848_p13 = scmp.ne.s32.totalorder %s176_s28, %s847_s7 }
  0x13   : > { %p856_p7 = scmp.lt.s32.totalorder %s847_s7, %s847_s7 }
  0x14   : > { %p838_p12 = pneg %p1073_p11 }
  0x15   : > { %p857_p10 = por %p856_p7, %p855_p5 }
  0x16   : > { %p850_p0 = pnand %p848_p13, %p838_p12 }
  0x18   : > { %p851_p3 = pneg %p850_p0 }
  0x1a   : > { %p858_p9 = pnand %p857_p10, %p851_p3 }
  0x1c   : > { %861 = shalt.err (!%p858_p9)
}
  0x1d   : > { %s1239_s8 = smov 64   ;;  %s989_s9 = smov 4  }
  0x1e   : > { %762 = dma.hbm_to_vmem [thread:$0]  (!%p1073_p11), %s1233_s1, 1024, %s176_s28, [#allocation6], %s1239_s8, %s1239_s8, %s989_s9  }
  0x1f   : > { %s873_s12 = scalar_lea.vmem %s192_s6, 1024  ;;  %p881_p10 = scmp.lt.s32.totalorder %s192_s6, %s192_s6 }
  0x20   : > { %p874_p13 = scmp.ne.s32.totalorder %s192_s6, %s873_s12  ;;  %p882_p3 = scmp.lt.s32.totalorder %s873_s12, %s873_s12 }
  0x22   : > { %p876_p0 = pnand %p874_p13, %p838_p12  ;;  %p883_p7 = por %p882_p3, %p881_p10 }
  0x24   : > { %p877_p5 = pneg %p876_p0 }
  0x26   : > { %p884_p9 = pnand %p883_p7, %p877_p5 }
  0x28   : > { %887 = shalt.err (!%p884_p9)
}
  0x29   : > { %765 = dma.hbm_to_vmem [thread:$0]  (!%p1073_p11), %s1235_s3, 1024, %s192_s6, [#allocation6], %s1239_s8, %s1239_s8, %s989_s9  }
  0x2a   : > { %s1102_s15 = sadd.s32 1, %s984_s21   ;;  %s29_s16 = sadd.s32 1, %s980_s20 }
  0x2b   : > { %s26_s17 = ssub.s32 %s984_s21, %s1102_s15  ;;  %p36_p12 = scmp.ne.s32.totalorder %s980_s20, %s976_s19 }
  0x2c   : > { %p27_p13 = scmp.eq.s32.totalorder %s26_s17, 0  ;;  %p37_p0 = scmp.eq.s32.totalorder %s984_s21, 0 }
  0x2d   : > { %p1112_p5 = por %p150_p2, %p36_p12  ;;  %p776_p10 = scmp.lt.s32.totalorder %s984_s21, 2 }
  0x2e   : > { %s1118_s27 = scalar_select %p27_p13, %s980_s20, %s29_s16  }
  0x2f   : > { %s1247_s23 = scalar_select %p1112_p5, 1, 0 }
  0x30   : > { %p38_p3 = por %p37_p0, %p36_p12  ;;  %s208_s28 = sand.u32 1, %s980_s20  }
  0x31   : > { %s652_s29 = sshll.u32 %s208_s28, 4  ;;  %s685_s30 = sshll.u32 %s984_s21, 8 }
  0x32   : > { %s1125_s10 = scalar_lea.hbm %s1232_s0, %s685_s30  ;;  %s212_s11 = scalar_lea.vmem [#allocation2], %s652_s29 }
  0x33   : > { %s219_s12 = sshll.u32 %s212_s11, 4  ;;  %p1129_p2 = pnand %p776_p10, %p38_p3  ;;  %s1127_s12 = int_to_ptr.vmem [resolvable:$true] %s219_s12 }
  0x34   : > { %s1133_s14 = scalar_lea.sflag [#allocation3], %s208_s28  ;;  %s888_s16 = scalar_lea.hbm %s1125_s10, 256 }
  0x35   : > { %p889_p11 = scmp.ne.s32.totalorder %s1125_s10, %s888_s16  ;;  %p890_p7 = pneg %p1129_p2 }
  0x36   : > { %s893_s29 = scalar_lea.hbm %s1232_s0, 512  ;;  %p894_p13 = scmp.lt.s32.totalorder %s1125_s10, %s1232_s0 }
  0x37   : > { %p891_p9 = pnand %p890_p7, %p889_p11  ;;  %p895_p0 = scmp.lt.s32.totalorder %s893_s29, %s888_s16 }
  0x39   : > { %p892_p12 = pneg %p891_p9  ;;  %p896_p10 = por %p895_p0, %p894_p13 }
  0x3b   : > { %p897_p3 = pnand %p896_p10, %p892_p12 }
  0x3d   : > { %900 = shalt.err (!%p897_p3)
}
  0x3e   : > { %s901_s28 = scalar_lea.vmem %s1127_s12, 256  ;;  %s990_s11 = smov [#allocation2]  }
  0x3f   : > { %p902_p1 = scmp.ne.s32.totalorder %s1127_s12, %s901_s28  ;;  %s906_s8 = sshll.u32 %s990_s11, 4  ;;  %s907_s8 = int_to_ptr.vmem [resolvable:$false] %s906_s8 }
  0x40   : > { %s908_s17 = scalar_lea.vmem %s907_s8, 512  ;;  %p909_p9 = scmp.lt.s32.totalorder %s1127_s12, %s907_s8 }
  0x41   : > { %p904_p6 = pnand %p902_p1, %p890_p7  ;;  %p910_p5 = scmp.lt.s32.totalorder %s908_s17, %s901_s28 }
  0x43   : > { %p905_p11 = pneg %p904_p6  ;;  %p911_p4 = por %p910_p5, %p909_p9 }
  0x45   : > { %p912_p8 = pnand %p911_p4, %p905_p11 }
  0x47   : > { %915 = shalt.err (!%p912_p8)
}
  0x48   : > { %s1249_s16 = smov 64   ;;  %p1250_p1 = scmp.ne.s32.totalorder %s1245_s26, 0 }
  0x49   : > { %769 = dma.hbm_to_vmem [thread:$0]  (!%p1129_p2), %s1125_s10, 256, %s1127_s12, %s1133_s14, %s1249_s16, %s1249_s16, %s989_s9  }
  0x4a   : > { %231 = sbr.rel (%p1250_p1) target bundleno = 537 (0x219), region = 40  ;;  %s1160_s30 = sand.u32 (!%p1250_p1), 1, %s976_s19  }
  0x4b   : > { %s656_s8 = sshll.u32 (!%p1250_p1), %s1160_s30, 4  ;;  %s234_s29 = scalar_lea.sflag (!%p1250_p1), [#allocation3], %s1160_s30 }
  0x4c   : > { %s1164_s6 = scalar_lea.vmem (!%p1250_p1), [#allocation2], %s656_s8  ;;  %p1251_p4 = scmp.ne.s32.totalorder (!%p1250_p1), %s1243_s24, 0 }
  0x4f   : > { %959 = dma.done.wait (%p1251_p4), %s234_s29, 256  }
  0x50   : > { %961 = vsyncadd (%p1251_p4), %s234_s29, 4294967040  ;;  %p1252_p6 = scmp.eq.s32.totalorder %s1045_s22, 0 }
  0x52   : > { %963 = dma.done.wait (%p1252_p6), [#allocation6], 2048   ;;  %p1253_p8 = pmov %p1252_p6 }
  0x53   : > { %v818_v0 = vld [vmem:[#allocation5 + $0x38] sm:$0xff]   ;;  %v819_v1 = vld [vmem:[#allocation5 + $0x30] sm:$0xff]   ;;  %v820_v2 = vld [vmem:[#allocation5 + $0x28] sm:$0xff]   ;;  %s659_s9 = sshll.u32 %s1160_s30, 5  ;;  %s686_s7 = sshll.u32 %s1045_s22, 9 }
  0x54   : > { %965 = vsyncadd (%p1253_p8), [#allocation6], 4294965248  ;;  %707 = vmatprep.subr.bf16.mxu0 %v818_v0  ;;  %v821_v3 = vld [vmem:[#allocation5 + $0x20] sm:$0xff]   ;;  %v828_v5 = vld [vmem:[#allocation7 + $0x38] sm:$0xff]   ;;  %s271_s13 = scalar_lea.vmem [#allocation8], %s659_s9  ;;  %s1189_s17 = scalar_lea.hbm %s1237_s5, %s686_s7 }
  0x55   : > { %708 = vmatpush3.bf16.msra.mxu0 %v818_v0  ;;  %v826_v4 = vld [vmem:[%s1164_s6] sm:$0xff]   ;;  %v822_v7 = vld [vmem:[#allocation5 + $0x18] sm:$0xff]   ;;  %727 = vmatprep.subr.bf16.mxu1 %v828_v5  ;;  %v830_v9 = vld [vmem:[#allocation7 + $0x28] sm:$0xff]   ;;  %s555_s14 = sshll.u32 %s271_s13, 4  ;;  %s542_s16 = scalar_lea.sflag [#allocation4], %s1160_s30  ;;  %s1184_s14 = int_to_ptr.vmem [resolvable:$true] %s555_s14 }
  0x56   : > { %709 = vmatprep.subr.bf16.mxu0 %v819_v1  ;;  %723 = vmatprep.mubr.bf16.mxu0 %v826_v4  ;;  %v829_v6 = vld [vmem:[#allocation7 + $0x30] sm:$0xff]   ;;  %v831_v10 = vld [vmem:[#allocation7 + $0x20] sm:$0xff]   ;;  %v824_v11 = vld [vmem:[#allocation5 + $0x8] sm:$0xff]   ;;  %s916_s8 = scalar_lea.vmem %s1184_s14, 512  ;;  %p1254_p2 = scmp.ne.s32.totalorder %s1247_s23, 0 }
  0x57   : > { %728 = vmatpush3.bf16.msra.mxu1 %v828_v5  ;;  %v823_v8 = vld [vmem:[#allocation5 + $0x10] sm:$0xff]   ;;  %v832_v12 = vld [vmem:[#allocation7 + $0x18] sm:$0xff]   ;;  %v825_v13 = vld [vmem:[#allocation5] sm:$0xff]   ;;  %p917_p5 = scmp.ne.s32.totalorder %s1184_s14, %s916_s8  ;;  %s991_s22 = smov [#allocation8]  }
  0x58   : > { %729 = vmatprep.subr.bf16.mxu1 %v829_v6  ;;  %v827_v14 = vld [vmem:[%s1164_s6 + $0x8] sm:$0xff]   ;;  %v833_v15 = vld [vmem:[#allocation7 + $0x10] sm:$0xff]   ;;  %v835_v17 = vld [vmem:[#allocation7] sm:$0xff]   ;;  %s920_s29 = sshll.u32 %s991_s22, 4  ;;  %s921_s29 = int_to_ptr.vmem [resolvable:$false] %s920_s29 }
  0x59   : > { %710 = vmatpush3.bf16.msra.mxu0 %v819_v1  ;;  %v834_v16 = vld [vmem:[#allocation7 + $0x8] sm:$0xff]   ;;  %v660_v20 = vld [vmem:[%s1234_s2] ss:$0 sm:$0xff]  ;;  %p918_p7 = pnand %p917_p5, %p1254_p2  ;;  %s922_s6 = scalar_lea.vmem %s921_s29, 1024 }
  0x5a   : > { %711 = vmatprep.subr.bf16.mxu0 %v820_v2  ;;  %v671_v33 = vld [vmem:[%s1236_s4] ss:$0 sm:$0xff]  ;;  %p923_p13 = scmp.lt.s32.totalorder %s1184_s14, %s921_s29  ;;  %p924_p0 = scmp.lt.s32.totalorder %s922_s6, %s916_s8 }
  0x5b   : > { %730 = vmatpush3.bf16.msra.mxu1 %v829_v6  ;;  %p919_p12 = pneg %p918_p7 }
  0x5c   : > { %731 = vmatprep.subr.bf16.mxu1 %v830_v9  ;;  %p925_p10 = por %p924_p0, %p923_p13 }
  0x5d   : > { %712 = vmatpush3.bf16.msra.mxu0 %v820_v2 }
  0x5e   : > { %713 = vmatprep.subr.bf16.mxu0 %v821_v3  ;;  %p926_p3 = pnand %p925_p10, %p919_p12 }
  0x5f   : > { %732 = vmatpush3.bf16.msra.mxu1 %v830_v9 }
  0x60   : > { %733 = vmatprep.subr.bf16.mxu1 %v831_v10 }
  0x61   : > { %714 = vmatpush3.bf16.msra.mxu0 %v821_v3 }
  0x62   : > { %715 = vmatprep.subr.bf16.mxu0 %v822_v7 }
  0x63   : > { %734 = vmatpush3.bf16.msra.mxu1 %v831_v10 }
  0x64   : > { %735 = vmatprep.subr.bf16.mxu1 %v832_v12 }
  0x65   : > { %716 = vmatpush3.bf16.msra.mxu0 %v822_v7 }
  0x66   : > { %717 = vmatprep.subr.bf16.mxu0 %v823_v8 }
  0x67   : > { %736 = vmatpush3.bf16.msra.mxu1 %v832_v12 }
  0x68   : > { %737 = vmatprep.subr.bf16.mxu1 %v833_v15 }
  0x69   : > { %718 = vmatpush3.bf16.msra.mxu0 %v823_v8 }
  0x6a   : > { %719 = vmatprep.subr.bf16.mxu0 %v824_v11 }
  0x6b   : > { %738 = vmatpush3.bf16.msra.mxu1 %v833_v15 }
  0x6c   : > { %739 = vmatprep.subr.bf16.mxu1 %v834_v16 }
  0x6d   : > { %720 = vmatpush3.bf16.msra.mxu0 %v824_v11 }
  0x6e   : > { %721 = vmatprep.subr.bf16.mxu0 %v825_v13 }
  0x6f   : > { %740 = vmatpush3.bf16.msra.mxu1 %v834_v16 }
  0x70   : > { %741 = vmatprep.subr.bf16.mxu1 %v835_v17 }
  0x71   : > { %722 = vmatpush3.bf16.msra.mxu0 %v825_v13 }
  0x73   : > { %742 = vmatpush3.bf16.msra.mxu1 %v835_v17 }
  0x74   : > { %724 = vmatmul.mubr.bf16.vlgmr.msra.gmra.mxu0 %v827_v14 }
 0x134   : > { %v725_v18 = vpop.f32.mrf.mxu0 }
 0x135   : > { %v405_v24 = vadd.f32 %v725_v18, %v660_v20 }
 0x136   : > { %v396_v19 = vpop.f32.mrf.mxu0 }
 0x137   : > { %v397_v22 = vadd.f32 %v660_v20, %v396_v19  ;;  %v413_v30 = vmax.f32 %v405_v24, 0.0 }
 0x138   : > { %v726_v21 = vpop.f32.mrf.mxu0 }
 0x139   : > { %v408_v23 = vadd.f32 %v726_v21, %v660_v20  ;;  %v411_v28 = vmax.f32 %v397_v22, 0.0 }
 0x13a   : > { %v399_v25 = vpop.f32.mrf.mxu0 }
 0x13b   : > { %v400_v26 = vadd.f32 %v660_v20, %v399_v25  ;;  %v414_v27 = vmax.f32 %v408_v23, 0.0 }
 0x13d   : > { %v412_v29 = vmax.f32 %v400_v26, 0.0  ;;  %v416_v32 = vpack.c.bf16 %v414_v27, %v413_v30 }
 0x13f   : > { %v415_v31 = vpack.c.bf16 %v412_v29, %v411_v28 }
 0x141   : > { %743 = vmatprep.mubr.bf16.mxu1 %v415_v31 }
 0x142   : > { %744 = vmatmul.mubr.bf16.vlgmr.msra.gmra.mxu1 %v416_v32 }
 0x202   : > { %v745_v34 = vpop.f32.mrf.mxu1 }
 0x203   : > { %v531_v35 = vadd.f32 %v745_v34, %v671_v33 }
 0x204   : > { %v522_v36 = vpop.f32.mrf.mxu1 }
 0x205   : > { %539 = vst [vmem:[%s271_s13 + $0x10] sm:$0xff] %v531_v35  ;;  %v523_v37 = vadd.f32 %v671_v33, %v522_v36 }
 0x206   : > { %v746_v38 = vpop.f32.mrf.mxu1 }
 0x207   : > { %537 = vst [vmem:[%s271_s13] sm:$0xff] %v523_v37  ;;  %v534_v39 = vadd.f32 %v746_v38, %v671_v33 }
 0x208   : > { %v525_v40 = vpop.f32.mrf.mxu1 }
 0x209   : > { %540 = vst [vmem:[%s271_s13 + $0x18] sm:$0xff] %v534_v39  ;;  %v526_v41 = vadd.f32 %v671_v33, %v525_v40 }
 0x20b   : > { %538 = vst [vmem:[%s271_s13 + $0x8] sm:$0xff] %v526_v41 }
 0x20c   : > { %929 = shalt.err (!%p926_p3)
}
 0x20d   : > { %s930_s24 = scalar_lea.hbm %s1189_s17, 512  ;;  %s934_s10 = scalar_lea.hbm %s1237_s5, 1024 }
 0x20e   : > { %p931_p11 = scmp.ne.s32.totalorder %s1189_s17, %s930_s24  ;;  %p935_p4 = scmp.lt.s32.totalorder %s1189_s17, %s1237_s5 }
 0x20f   : > { %p936_p6 = scmp.lt.s32.totalorder %s934_s10, %s930_s24 }
 0x210   : > { %p932_p9 = pnand %p931_p11, %p1254_p2 }
 0x211   : > { %p937_p8 = por %p936_p6, %p935_p4 }
 0x212   : > { %p933_p1 = pneg %p932_p9 }
 0x214   : > { %p938_p5 = pnand %p937_p8, %p933_p1 }
 0x216   : > { %941 = shalt.err (!%p938_p5)
}
 0x217   : > { %s992_s7 = smov 128   ;;  %s993_s28 = smov 8  }
 0x218   : > { %757 = dma.vmem_to_hbm [thread:$0]  (%p1254_p2), %s1184_s14, 512, %s1189_s17, %s542_s16, %s992_s7, %s992_s7, %s993_s28  }
 0x219 PF: > { %s570_s11 = sand.u32 1, %s972_s18   ;;  %p1255_p7 = scmp.ne.s32.totalorder %s1244_s25, 0 }
 0x21a   : > { %p1256_p12 = scmp.ge.s32.totalorder %s984_s21, 2  ;;  %s571_s8 = scalar_lea.sflag [#allocation4], %s570_s11 }
 0x21c   : > { %p771_p13 = pnand %p1256_p12, %p1255_p7 }
 0x21e   : > { %p772_p0 = pneg %p771_p13 }
 0x220   : > { %967 = dma.done.wait (%p772_p0), %s571_s8, 512  }
 0x221   : > { %969 = vsyncadd (%p772_p0), %s571_s8, 4294966784  ;;  %p19_p10 = scmp.ge.s32.totalorder %s1102_s15, 4   ;;  %s1257_s18 = smov %s976_s19 }
 0x222   : > { %s1258_s19 = smov %s980_s20  ;;  %s1259_s20 = smov %s1118_s27 }
 0x223   : > { %s1260_s21 = smov %s1102_s15  ;;  %21 = sbr.rel (!%p19_p10) target bundleno = 6 (0x6), region = 93 }
 0x228   :  { %576 = vsyncpa [#allocation3], 1 }
 0x229   :  { %578 = vsyncpa [#allocation3 + $0x1], 1 }
 0x22a   :  { %579 = vsyncpa [#allocation6], 1 }
 0x22b   :  { %580 = vsyncpa [#allocation4], 1 }
 0x22c   :  { %582 = vsyncpa [#allocation4 + $0x1], 1 }

</bundles_post_ra>
